<compile_context>
chip_gen: v5e
topology: v5e:2x2
jax: 0.10.0
libtpu: 0.0.40
codegen_flags: <defaults>
</compile_context>

<pallas_src>
import jax
import jax.numpy as jnp
from jax.experimental import pallas as pl
from jax.experimental.pallas import tpu as pltpu


def _conv1x1_kernel(w_ref, x_ref, o_ref):
    # w_ref: (Cout, Cin)  stored dtype (bf16 by default, or f32)
    # x_ref: (Cin, M)     f32 activation (M = N*HW)
    # o_ref: (Cout, M)    f32 output
    w = w_ref[...]
    x = x_ref[...].astype(w.dtype)  # in-kernel cast; f32 never round-trips HBM
    o_ref[...] = jnp.dot(w, x, preferred_element_type=jnp.float32).astype(o_ref.dtype)


def prepare_conv1x1_weight(weight_oihw: jax.Array, dtype=jnp.bfloat16) -> jax.Array:
    """Init-time weight prep: (Cout, Cin, 1, 1) -> (Cout, Cin), stored in `dtype`.

    Done once, outside the per-call path, so there is no per-call convert op.
    Use dtype=jnp.float32 if strict fp32 parity with the PyTorch Conv2d is needed.
    """
    cout, cin = weight_oihw.shape[0], weight_oihw.shape[1]
    return weight_oihw.reshape(cout, cin).astype(dtype)


def conv2d_1x1(x_nchw: jax.Array, w_mat: jax.Array) -> jax.Array:
    """1x1 stride-1 conv, no bias.  x: (N, Cin, H, W), w_mat: (Cout, Cin)."""
    n, cin, h, w = x_nchw.shape
    cout = w_mat.shape[0]
    hw = h * w
    m = n * hw

    # (N, Cin, H, W) -> (Cin, N*HW).  Pure reshape for N == 1 (this module).
    if n == 1:
        x_mat = x_nchw.reshape(cin, m)
    else:
        # TODO(synk): for N > 1 prefer an upstream channel-minor layout or a
        # grid axis over N instead of this wrapper-side transpose.
        x_mat = jnp.moveaxis(x_nchw, 1, 0).reshape(cin, m)

    w_bytes = w_mat.size * jnp.dtype(w_mat.dtype).itemsize
    x_bytes = x_mat.size * jnp.dtype(x_mat.dtype).itemsize
    o_bytes = cout * m * jnp.dtype(x_nchw.dtype).itemsize

    out = pl.pallas_call(
        _conv1x1_kernel,
        out_shape=jax.ShapeDtypeStruct((cout, m), x_nchw.dtype),
        in_specs=[
            pl.BlockSpec(memory_space=pltpu.MemorySpace.VMEM),
            pl.BlockSpec(memory_space=pltpu.MemorySpace.VMEM),
        ],
        out_specs=pl.BlockSpec(memory_space=pltpu.MemorySpace.VMEM),
        cost_estimate=pl.CostEstimate(
            flops=2 * cout * cin * m,
            bytes_accessed=w_bytes + x_bytes + o_bytes,
            transcendentals=0,
        ),
    )(w_mat, x_mat)

    # (Cout, N*HW) -> (N, Cout, H, W).  Pure reshape for N == 1.
    if n == 1:
        return out.reshape(n, cout, h, w)
    return jnp.moveaxis(out.reshape(cout, n, h, w), 0, 1)


if __name__ == "__main__":
    key = jax.random.PRNGKey(0)
    kx, kw = jax.random.split(key)

    # Shapes implied by the module's forward: x166 = randn(1, 832, 7, 7)
    x = jax.random.normal(kx, (1, 832, 7, 7), dtype=jnp.float32)
    # Conv2d(832, 160, kernel_size=1, bias=False) weight: (160, 832, 1, 1)
    fan_in = 832
    bound = 1.0 / (fan_in ** 0.5)
    weight = jax.random.uniform(
        kw, (160, 832, 1, 1), dtype=jnp.float32, minval=-bound, maxval=bound
    )

    # Init-time ("stored") weight prep -- not part of the per-call path.
    w_mat = prepare_conv1x1_weight(weight, dtype=jnp.bfloat16)

    out = conv2d_1x1(x, w_mat)
    out = jax.block_until_ready(out)

    # Reference in plain JAX fp32 (1x1 conv == channel matmul).  Tolerance
    # relaxed because the MXU operands are bf16 (fp32 accumulation over K=832);
    # use prepare_conv1x1_weight(..., dtype=jnp.float32) for strict parity.
    ref = jnp.einsum("nchw,oc->nohw", x, weight.reshape(160, 832))
    assert out.shape == (1, 160, 7, 7), out.shape
    assert jnp.allclose(out, ref, atol=2e-2, rtol=2e-2), float(
        jnp.max(jnp.abs(out - ref))
    )

    print("KERNEL_OK")
</pallas_src>

<mosaic_0001>
module attributes {stable_mosaic.version = 11 : i64} {
  func.func @_conv1x1_kernel(%arg0: memref<160x832xbf16, #tpu.memory_space<vmem>>, %arg1: memref<832x49xf32, #tpu.memory_space<vmem>>, %arg2: memref<160x49xf32, #tpu.memory_space<vmem>>) attributes {dimension_semantics = [], scalar_prefetch = 0 : i64, scratch_operands = 0 : i64, tpu.core_type = #tpu.core_type<tc>} {
    %c0 = arith.constant 0 : index
    %c0_0 = arith.constant 0 : index
    %0 = vector.load %arg0[%c0, %c0_0] : memref<160x832xbf16, #tpu.memory_space<vmem>>, vector<160x832xbf16>
    %c0_1 = arith.constant 0 : index
    %c0_2 = arith.constant 0 : index
    %1 = vector.load %arg1[%c0_1, %c0_2] : memref<832x49xf32, #tpu.memory_space<vmem>>, vector<832x49xf32>
    %2 = arith.truncf %1 : vector<832x49xf32> to vector<832x49xbf16>
    %cst = arith.constant dense<0.000000e+00> : vector<160x49xf32>
    %3 = tpu.matmul %0, %2, %cst {dimension_numbers = #tpu.dot_dimension_numbers<[1], [0], [0], [1], [0, 0, 1, 1], [], []>} : vector<160x832xbf16>, vector<832x49xbf16>, vector<160x49xf32> -> vector<160x49xf32>
    %c0_3 = arith.constant 0 : index
    %c0_4 = arith.constant 0 : index
    %4 = vector.load %arg2[%c0_3, %c0_4] : memref<160x49xf32, #tpu.memory_space<vmem>>, vector<160x49xf32>
    tpu.vector_store %arg2[%c0_3, %c0_4], %3 {strides = array<i32>} : memref<160x49xf32, #tpu.memory_space<vmem>>, vector<160x49xf32>,
    return
  }
}

</mosaic_0001>

<bundles_post_ra>
// kernel: tpu_custom_call.1
= control target key start
LH: loop header
LB: loop body
LE: loop exit
PB: predicated region body
PF: predicated region fallthrough
CT: control target
= control target key end

     0   :  { %vm598_vm0 = vcmask 523264   ;;  %vm1042_vm1 = vcmask 400384   ;;  %s2445_s1 = inlined_call_operand.vmem [shape: f32[832,49], index: 1, kind: input, shape index: {}]   ;;  %s2446_s0 = inlined_call_operand.vmem [shape: bf16[160,832], index: 0, kind: input, shape index: {}]   ;;  %s2447_s2 = inlined_call_operand.vmem [shape: f32[160,49], index: 2, kind: output, shape index: {}]  }
   0x1   :  { %v106_v0 = vld [vmem:[%s2445_s1 + $0x70] sm:$0xff]  ;;  %v107_v1 = vld [vmem:[%s2445_s1 + $0x78] sm:$0xff]  ;;  %v104_v9 = vld [vmem:[%s2445_s1 + $0x60] sm:$0xff] }
   0x2   :  { %v138_v2 = vld [vmem:[%s2445_s1 + $0x170] sm:$0xff]  ;;  %v203_v3 = vpack.c.bf16 %v107_v1, %v106_v0  ;;  %v139_v4 = vld [vmem:[%s2445_s1 + $0x178] sm:$0xff]  ;;  %v105_v10 = vld [vmem:[%s2445_s1 + $0x68] sm:$0xff] }
   0x3   :  { %v122_v5 = vld [vmem:[%s2445_s1 + $0xf0] sm:$0xff]  ;;  %v123_v6 = vld [vmem:[%s2445_s1 + $0xf8] sm:$0xff]  ;;  %v1484_v7 = vpack.c.bf16 %v139_v4, %v138_v2  ;;  %v136_v11 = vld [vmem:[%s2445_s1 + $0x160] sm:$0xff]  ;;  %v202_v12 = vpack.c.bf16 %v105_v10, %v104_v9 }
   0x4   :  { %v1486_v8 = vpack.c.bf16 %v123_v6, %v122_v5  ;;  %629 = vmatpush.bf16.msra.mxu0 %v203_v3  ;;  %1427 = vmatpush.bf16.msra.mxu3 %v203_v3  ;;  %v137_v13 = vld [vmem:[%s2445_s1 + $0x168] sm:$0xff]  ;;  %v120_v14 = vld [vmem:[%s2445_s1 + $0xe0] sm:$0xff]  ;;  %v102_v18 = vld [vmem:[%s2445_s1 + $0x50] sm:$0xff] }
   0x5   :  { %v121_v15 = vld [vmem:[%s2445_s1 + $0xe8] sm:$0xff]  ;;  %1443 = vmatpush.bf16.msra.mxu2 %v1484_v7  ;;  %v1508_v16 = vpack.c.bf16 %v137_v13, %v136_v11  ;;  %v103_v19 = vld [vmem:[%s2445_s1 + $0x58] sm:$0xff]  ;;  %v134_v20 = vld [vmem:[%s2445_s1 + $0x150] sm:$0xff] }
   0x6   :  { %1435 = vmatpush.bf16.msra.mxu1 %v1486_v8  ;;  %v1510_v17 = vpack.c.bf16 %v121_v15, %v120_v14  ;;  %v135_v21 = vld [vmem:[%s2445_s1 + $0x158] sm:$0xff]  ;;  %v118_v22 = vld [vmem:[%s2445_s1 + $0xd0] sm:$0xff]  ;;  %v201_v24 = vpack.c.bf16 %v103_v19, %v102_v18  ;;  %v100_v27 = vld [vmem:[%s2445_s1 + $0x40] sm:$0xff] }
   0x7   :  { %v119_v23 = vld [vmem:[%s2445_s1 + $0xd8] sm:$0xff]  ;;  %v1532_v25 = vpack.c.bf16 %v135_v21, %v134_v20  ;;  %v101_v28 = vld [vmem:[%s2445_s1 + $0x48] sm:$0xff]  ;;  %v132_v29 = vld [vmem:[%s2445_s1 + $0x140] sm:$0xff] }
   0x8   :  { %630 = vmatpush.bf16.msra.mxu0 %v202_v12  ;;  %1428 = vmatpush.bf16.msra.mxu3 %v202_v12  ;;  %v1534_v26 = vpack.c.bf16 %v119_v23, %v118_v22  ;;  %v133_v30 = vld [vmem:[%s2445_s1 + $0x148] sm:$0xff]  ;;  %v116_v31 = vld [vmem:[%s2445_s1 + $0xc0] sm:$0xff]  ;;  %v200_v33 = vpack.c.bf16 %v101_v28, %v100_v27  ;;  %v98_v36 = vld [vmem:[%s2445_s1 + $0x30] sm:$0xff] }
   0x9   :  { %1444 = vmatpush.bf16.msra.mxu2 %v1508_v16  ;;  %v117_v32 = vld [vmem:[%s2445_s1 + $0xc8] sm:$0xff]  ;;  %v1556_v34 = vpack.c.bf16 %v133_v30, %v132_v29  ;;  %v99_v37 = vld [vmem:[%s2445_s1 + $0x38] sm:$0xff]  ;;  %v130_v38 = vld [vmem:[%s2445_s1 + $0x130] sm:$0xff] }
   0xa   :  { %1436 = vmatpush.bf16.msra.mxu1 %v1510_v17  ;;  %v1558_v35 = vpack.c.bf16 %v117_v32, %v116_v31  ;;  %v131_v39 = vld [vmem:[%s2445_s1 + $0x138] sm:$0xff]  ;;  %v114_v40 = vld [vmem:[%s2445_s1 + $0xb0] sm:$0xff]  ;;  %v199_v42 = vpack.c.bf16 %v99_v37, %v98_v36  ;;  %v96_v45 = vld [vmem:[%s2445_s1 + $0x20] sm:$0xff] }
   0xb   :  { %v115_v41 = vld [vmem:[%s2445_s1 + $0xb8] sm:$0xff]  ;;  %v1580_v43 = vpack.c.bf16 %v131_v39, %v130_v38  ;;  %v97_v46 = vld [vmem:[%s2445_s1 + $0x28] sm:$0xff]  ;;  %v128_v47 = vld [vmem:[%s2445_s1 + $0x120] sm:$0xff] }
   0xc   :  { %631 = vmatpush.bf16.msra.mxu0 %v201_v24  ;;  %1429 = vmatpush.bf16.msra.mxu3 %v201_v24  ;;  %v1582_v44 = vpack.c.bf16 %v115_v41, %v114_v40  ;;  %v129_v48 = vld [vmem:[%s2445_s1 + $0x128] sm:$0xff]  ;;  %v112_v49 = vld [vmem:[%s2445_s1 + $0xa0] sm:$0xff]  ;;  %v198_v51 = vpack.c.bf16 %v97_v46, %v96_v45  ;;  %v94_v54 = vld [vmem:[%s2445_s1 + $0x10] sm:$0xff] }
   0xd   :  { %1445 = vmatpush.bf16.msra.mxu2 %v1532_v25  ;;  %v113_v50 = vld [vmem:[%s2445_s1 + $0xa8] sm:$0xff]  ;;  %v1604_v52 = vpack.c.bf16 %v129_v48, %v128_v47  ;;  %v95_v55 = vld [vmem:[%s2445_s1 + $0x18] sm:$0xff]  ;;  %v126_v56 = vld [vmem:[%s2445_s1 + $0x110] sm:$0xff] }
   0xe   :  { %1437 = vmatpush.bf16.msra.mxu1 %v1534_v26  ;;  %v1606_v53 = vpack.c.bf16 %v113_v50, %v112_v49  ;;  %v127_v57 = vld [vmem:[%s2445_s1 + $0x118] sm:$0xff]  ;;  %v110_v58 = vld [vmem:[%s2445_s1 + $0x90] sm:$0xff]  ;;  %v197_v60 = vpack.c.bf16 %v95_v55, %v94_v54  ;;  %v92_v61 = vld [vmem:[%s2445_s1] sm:$0xff] }
   0xf   :  { %v111_v59 = vld [vmem:[%s2445_s1 + $0x98] sm:$0xff]  ;;  %v93_v62 = vld [vmem:[%s2445_s1 + $0x8] sm:$0xff]  ;;  %v1634_v63 = vpack.c.bf16 %v127_v57, %v126_v56  ;;  %v124_v1 = vld [vmem:[%s2445_s1 + $0x100] sm:$0xff] }
  0x10   :  { %632 = vmatpush.bf16.msra.mxu0 %v200_v33  ;;  %1430 = vmatpush.bf16.msra.mxu3 %v200_v33  ;;  %v1636_v0 = vpack.c.bf16 %v111_v59, %v110_v58  ;;  %v125_v2 = vld [vmem:[%s2445_s1 + $0x108] sm:$0xff]  ;;  %v108_v3 = vld [vmem:[%s2445_s1 + $0x80] sm:$0xff]  ;;  %v1360_v6 = vld [vmem:[%s2446_s0 + $0x18] sm:$0xf0]  ;;  %v196_v12 = vpack.c.bf16 %v93_v62, %v92_v61 }
  0x11   :  { %1446 = vmatpush.bf16.msra.mxu2 %v1556_v34  ;;  %v109_v4 = vld [vmem:[%s2445_s1 + $0x88] sm:$0xff]  ;;  %v1069_v5 = vld [vmem:[%s2446_s0] sm:$0xf]  ;;  %v1125_v9 = vld [vmem:[%s2446_s0 + $0x70] sm:$0xf]  ;;  %v1676_v18 = vpack.c.bf16 %v125_v2, %v124_v1 }
  0x12   :  { %1438 = vmatpush.bf16.msra.mxu1 %v1558_v35  ;;  %v154_v10 = vld [vmem:[%s2445_s1 + $0x1f0] sm:$0xff]  ;;  %v155_v11 = vld [vmem:[%s2445_s1 + $0x1f8] sm:$0xff]  ;;  %v1374_v13 = vld [vmem:[%s2446_s0 + $0x88] sm:$0xf0]  ;;  %v1678_v19 = vpack.c.bf16 %v109_v4, %v108_v3  ;;  %v1070_v29 = vor.u32 %v1360_v6, %v1069_v5 }
  0x13   :  { %v1133_v14 = vld [vmem:[%s2446_s0 + $0x78] sm:$0xf]  ;;  %v1375_v15 = vld [vmem:[%s2446_s0 + $0x90] sm:$0xf0]  ;;  %v1127_v21 = vld [vmem:[%s2446_s0 + $0x8c] sm:$0xf0]  ;;  %v227_v23 = vpack.c.bf16 %v155_v11, %v154_v10  ;;  %v1126_v30 = vor.u32 %v1374_v13, %v1125_v9 }
  0x14   :  { %633 = vmatpush.bf16.msra.mxu0 %v199_v42  ;;  %1431 = vmatpush.bf16.msra.mxu3 %v199_v42  ;;  %v1371_v20 = vld [vmem:[%s2446_s0 + $0x74] sm:$0xf]  ;;  %v195_v24 = vld [vmem:[%s2445_s1 + $0x338] sm:$0xff]  ;;  %v152_v31 = vld [vmem:[%s2445_s1 + $0x1e0] sm:$0xff]  ;;  %v1134_v33 = vor.u32 %v1375_v15, %v1133_v14 }
  0x15   :  { %1447 = vmatpush.bf16.msra.mxu2 %v1580_v43  ;;  %v194_v22 = vld [vmem:[%s2445_s1 + $0x330] sm:$0xff]  ;;  %v187_v28 = vld [vmem:[%s2445_s1 + $0x2f8] sm:$0xff]  ;;  %v153_v32 = vld [vmem:[%s2445_s1 + $0x1e8] sm:$0xff]  ;;  %v1130_v36 = vor.u32 %v1371_v20, %v1127_v21 }
  0x16   :  { %1439 = vmatpush.bf16.msra.mxu1 %v1582_v44  ;;  %v186_v27 = vld [vmem:[%s2445_s1 + $0x2f0] sm:$0xff]  ;;  %v247_v37 = vpack.c.bf16 %v195_v24, %v194_v22  ;;  %v226_v39 = vpack.c.bf16 %v153_v32, %v152_v31  ;;  %v184_v40 = vld [vmem:[%s2445_s1 + $0x2e0] sm:$0xff]  ;;  %v185_v41 = vld [vmem:[%s2445_s1 + $0x2e8] sm:$0xff] }
  0x17   :  { %v243_v38 = vpack.c.bf16 %v187_v28, %v186_v27  ;;  %v150_v42 = vld [vmem:[%s2445_s1 + $0x1d0] sm:$0xff]  ;;  %v242_v45 = vpack.c.bf16 %v185_v41, %v184_v40  ;;  %v192_v46 = vld [vmem:[%s2445_s1 + $0x320] sm:$0xff]  ;;  %v193_v47 = vld [vmem:[%s2445_s1 + $0x328] sm:$0xff] }
  0x18   :  { %634 = vmatpush.bf16.msra.mxu0 %v198_v51  ;;  %1432 = vmatpush.bf16.msra.mxu3 %v198_v51  ;;  %v246_v49 = vpack.c.bf16 %v193_v47, %v192_v46  ;;  %v182_v50 = vld [vmem:[%s2445_s1 + $0x2d0] sm:$0xff]  ;;  %v183_v51 = vld [vmem:[%s2445_s1 + $0x2d8] sm:$0xff]  ;;  %v1153_v56 = vld [vmem:[%s2446_s0 + $0xa8] sm:$0xf] }
  0x19   :  { %1448 = vmatpush.bf16.msra.mxu2 %v1604_v52  ;;  %v241_v54 = vpack.c.bf16 %v183_v51, %v182_v50  ;;  %v1367_v55 = vld [vmem:[%s2446_s0 + $0x50] sm:$0xf0]  ;;  %v1381_v57 = vld [vmem:[%s2446_s0 + $0xc0] sm:$0xf0]  ;;  %v1382_v58 = vld [vmem:[%s2446_s0 + $0xc8] sm:$0xf0] }
  0x1a   :  { %1440 = vmatpush.bf16.msra.mxu1 %v1606_v53  ;;  %v1378_v59 = vld [vmem:[%s2446_s0 + $0xac] sm:$0xf]  ;;  %v1154_v62 = vor.u32 %v1381_v57, %v1153_v56  ;;  %v148_v3 = vld [vmem:[%s2445_s1 + $0x1c0] sm:$0xff]  ;;  %v147_v24 = vld [vmem:[%s2445_s1 + $0x1b8] sm:$0xff] }
  0x1b   :  { %v149_v4 = vld [vmem:[%s2445_s1 + $0x1c8] sm:$0xff]  ;;  %v1181_v9 = vld [vmem:[%s2446_s0 + $0xe0] sm:$0xf]  ;;  %v1357_v10 = vld [vmem:[%s2446_s0 + $0x4] sm:$0xf] }
  0x1c   :  { %635 = vmatpush.bf16.msra.mxu0 %v197_v60  ;;  %1433 = vmatpush.bf16.msra.mxu3 %v197_v60  ;;  %v1155_v60 = vld [vmem:[%s2446_s0 + $0xc4] sm:$0xf0]  ;;  %v224_v5 = vpack.c.bf16 %v149_v4, %v148_v3  ;;  %v1071_v11 = vld [vmem:[%s2446_s0 + $0x1c] sm:$0xf0]  ;;  %v1385_v13 = vld [vmem:[%s2446_s0 + $0xe4] sm:$0xf] }
  0x1d   :  { %1449 = vmatpush.bf16.msra.mxu2 %v1634_v63  ;;  %v1158_v2 = vor.u32 %v1378_v59, %v1155_v60  ;;  %v1183_v14 = vld [vmem:[%s2446_s0 + $0xfc] sm:$0xf0]  ;;  %v1074_v20 = vor.u32 %v1357_v10, %v1071_v11  ;;  %v191_v27 = vld [vmem:[%s2445_s1 + $0x318] sm:$0xff]  ;;  %v178_v28 = vld [vmem:[%s2445_s1 + $0x2b0] sm:$0xff] }
  0x1e   :  { %1441 = vmatpush.bf16.msra.mxu1 %v1636_v0  ;;  %v1186_v22 = vor.u32 %v1385_v13, %v1183_v14  ;;  %v1395_v32 = vld [vmem:[%s2446_s0 + $0x130] sm:$0xf0]  ;;  %v176_v46 = vld [vmem:[%s2445_s1 + $0x2a0] sm:$0xff]  ;;  %v1402_v50 = vld [vmem:[%s2446_s0 + $0x168] sm:$0xf0] }
  0x1f   :  { %v1361_v51 = vld [vmem:[%s2446_s0 + $0x20] sm:$0xf0]  ;;  %v171_v59 = vld [vmem:[%s2445_s1 + $0x278] sm:$0xff]  ;;  %v169_v3 = vld [vmem:[%s2445_s1 + $0x268] sm:$0xff] }
  0x20   :  { %636 = vmatpush.bf16.msra.mxu0 %v196_v12  ;;  %1434 = vmatpush.bf16.msra.mxu3 %v196_v12  ;;  %v1389_v12 = vld [vmem:[%s2446_s0 + $0x100] sm:$0xf0]  ;;  %v175_v10 = vld [vmem:[%s2445_s1 + $0x298] sm:$0xff]  ;;  %v165_v13 = vld [vmem:[%s2445_s1 + $0x248] sm:$0xff] }
  0x21   :  { %1450 = vmatpush.bf16.msra.mxu2 %v1676_v18  ;;  %v188_v4 = vld [vmem:[%s2445_s1 + $0x300] sm:$0xff]  ;;  %v1265_v14 = vld [vmem:[%s2446_s0 + $0x188] sm:$0xf] }
  0x22   :  { %1442 = vmatpush.bf16.msra.mxu1 %v1678_v19 }
  0x23   :  { %637 = vmatmul.bf16.vlgmr.msra.gmra.mxu0 %v1070_v29  ;;  %647 = vmatmul.bf16.vlgmr.msra.gmra.mxu3 %v1126_v30  ;;  %v179_v29 = vld [vmem:[%s2445_s1 + $0x2b8] sm:$0xff] }
  0x24   :  { %806 = vmatpush.bf16.msrb.mxu3 %v227_v23  ;;  %688 = vmatpush.bf16.msrb.mxu0 %v1486_v8  ;;  %v151_v8 = vld [vmem:[%s2445_s1 + $0x1d8] sm:$0xff]  ;;  %v146_v23 = vld [vmem:[%s2445_s1 + $0x1b0] sm:$0xff]  ;;  %v239_v31 = vpack.c.bf16 %v179_v29, %v178_v28 }
  0x25   :  { %765 = vmatmul.bf16.vlgmr.msra.gmra.mxu2 %v1134_v33  ;;  %706 = vmatmul.bf16.vlgmr.msra.gmra.mxu1 %v1130_v36  ;;  %v225_v48 = vpack.c.bf16 %v151_v8, %v150_v42  ;;  %v1364_v33 = vld [vmem:[%s2446_s0 + $0x3c] sm:$0xf]  ;;  %v1099_v36 = vld [vmem:[%s2446_s0 + $0x54] sm:$0xf0] }
  0x26   :  { %987 = vmatpush.bf16.msrb.mxu2 %v247_v37  ;;  %924 = vmatpush.bf16.msrb.mxu1 %v243_v38  ;;  %v1396_v37 = vld [vmem:[%s2446_s0 + $0x138] sm:$0xf0]  ;;  %v1102_v41 = vor.u32 %v1364_v33, %v1099_v36  ;;  %v140_v33 = vld [vmem:[%s2445_s1 + $0x180] sm:$0xff]  ;;  %v141_v36 = vld [vmem:[%s2445_s1 + $0x188] sm:$0xff] }
  0x27   :  { %v1392_v38 = vld [vmem:[%s2446_s0 + $0x11c] sm:$0xf] }
  0x28   :  { %689 = vmatpush.bf16.msrb.mxu0 %v1510_v17  ;;  %807 = vmatpush.bf16.msrb.mxu3 %v226_v39  ;;  %v1097_v17 = vld [vmem:[%s2446_s0 + $0x38] sm:$0xf] }
  0x29   :  { %v1098_v61 = vor.u32 %v1367_v55, %v1097_v17  ;;  %v1211_v39 = vld [vmem:[%s2446_s0 + $0x134] sm:$0xf0]  ;;  %v1399_v17 = vld [vmem:[%s2446_s0 + $0x154] sm:$0xf]  ;;  %v1239_v55 = vld [vmem:[%s2446_s0 + $0x16c] sm:$0xf0] }
  0x2a   :  { %925 = vmatpush.bf16.msrb.mxu1 %v242_v45  ;;  %988 = vmatpush.bf16.msrb.mxu2 %v246_v49  ;;  %v1214_v8 = vor.u32 %v1392_v38, %v1211_v39  ;;  %v145_v45 = vld [vmem:[%s2445_s1 + $0x1a8] sm:$0xff]  ;;  %v1237_v49 = vld [vmem:[%s2446_s0 + $0x150] sm:$0xf] }
  0x2b   :  { %v1238_v56 = vor.u32 %v1402_v50, %v1237_v49  ;;  %v161_v38 = vld [vmem:[%s2445_s1 + $0x228] sm:$0xff]  ;;  %v158_v39 = vld [vmem:[%s2445_s1 + $0x210] sm:$0xff]  ;;  %v1413_v49 = vld [vmem:[%s2446_s0 + $0x1c4] sm:$0xf] }
  0x2c   :  { %690 = vmatpush.bf16.msrb.mxu0 %v1534_v26  ;;  %808 = vmatpush.bf16.msrb.mxu3 %v225_v48  ;;  %v1161_v26 = vld [vmem:[%s2446_s0 + $0xb0] sm:$0xf]  ;;  %v1295_v50 = vld [vmem:[%s2446_s0 + $0x1dc] sm:$0xf0] }
  0x2d   :  { %v1162_v1 = vor.u32 %v1382_v58, %v1161_v26  ;;  %v1242_v58 = vor.u32 %v1399_v17, %v1239_v55  ;;  %v1298_v55 = vor.u32 %v1413_v49, %v1295_v50 }
  0x2e   :  { %926 = vmatpush.bf16.msrb.mxu1 %v241_v54  ;;  %v1403_v54 = vld [vmem:[%s2446_s0 + $0x170] sm:$0xf0] }
  0x30   :  { %691 = vmatpush.bf16.msrb.mxu0 %v1558_v35  ;;  %809 = vmatpush.bf16.msrb.mxu3 %v224_v5  ;;  %v180_v35 = vld [vmem:[%s2445_s1 + $0x2c0] sm:$0xff]  ;;  %v189_v5 = vld [vmem:[%s2445_s1 + $0x308] sm:$0xff] }
  0x33   :  { %642 = vmatmul.bf16.gmra.mxu0 %v1098_v61  ;;  %652 = vmatmul.bf16.gmra.mxu3 %v1154_v62  ;;  %v142_v61 = vld [vmem:[%s2445_s1 + $0x190] sm:$0xff]  ;;  %v143_v62 = vld [vmem:[%s2445_s1 + $0x198] sm:$0xff] }
  0x34   :  { %692 = vmatpush.bf16.msrb.mxu0 %v1582_v44  ;;  %v181_v44 = vld [vmem:[%s2445_s1 + $0x2c8] sm:$0xff] }
  0x35   :  { %770 = vmatmul.bf16.gmra.mxu2 %v1162_v1  ;;  %711 = vmatmul.bf16.gmra.mxu1 %v1158_v2  ;;  %v240_v6 = vpack.c.bf16 %v181_v44, %v180_v35  ;;  %v168_v1 = vld [vmem:[%s2445_s1 + $0x260] sm:$0xff]  ;;  %v221_v2 = vpack.c.bf16 %v143_v62, %v142_v61  ;;  %v244_v44 = vpack.c.bf16 %v189_v5, %v188_v4  ;;  %v1420_v61 = vld [vmem:[%s2446_s0 + $0x1fc] sm:$0xf]  ;;  %v1323_v62 = vld [vmem:[%s2446_s0 + $0x214] sm:$0xf0] }
  0x36   :  { %v234_v35 = vpack.c.bf16 %v169_v3, %v168_v1  ;;  %v1326_v3 = vor.u32 %v1420_v61, %v1323_v62  ;;  %v1113_v4 = vld [vmem:[%s2446_s0 + $0x48] sm:$0xf]  ;;  %v1369_v5 = vld [vmem:[%s2446_s0 + $0x60] sm:$0xf0] }
  0x37   :  { %927 = vmatpush.bf16.msrb.mxu1 %v240_v6  ;;  %v166_v6 = vld [vmem:[%s2445_s1 + $0x250] sm:$0xff] }
  0x38   :  { %693 = vmatpush.bf16.msrb.mxu0 %v1606_v53  ;;  %v1388_v53 = vld [vmem:[%s2446_s0 + $0xf8] sm:$0xf0] }
  0x39   :  { %v1182_v15 = vor.u32 %v1388_v53, %v1181_v9  ;;  %v167_v9 = vld [vmem:[%s2445_s1 + $0x258] sm:$0xff]  ;;  %v174_v53 = vld [vmem:[%s2445_s1 + $0x290] sm:$0xff] }
  0x3a   :  { %v237_v11 = vpack.c.bf16 %v175_v10, %v174_v53  ;;  %v1363_v53 = vld [vmem:[%s2446_s0 + $0x30] sm:$0xf0] }
  0x3b   :  { %928 = vmatpush.bf16.msrb.mxu1 %v239_v31  ;;  %v162_v31 = vld [vmem:[%s2445_s1 + $0x230] sm:$0xff] }
  0x3c   :  { %694 = vmatpush.bf16.msrb.mxu0 %v1636_v0  ;;  %v1189_v0 = vld [vmem:[%s2446_s0 + $0xe8] sm:$0xf]  ;;  %v1359_v10 = vld [vmem:[%s2446_s0 + $0x14] sm:$0xf] }
  0x3d   :  { %v1190_v21 = vor.u32 %v1389_v12, %v1189_v0  ;;  %v233_v0 = vpack.c.bf16 %v167_v9, %v166_v6  ;;  %v164_v12 = vld [vmem:[%s2445_s1 + $0x240] sm:$0xff]  ;;  %v1079_v6 = vld [vmem:[%s2446_s0 + $0x24] sm:$0xf0]  ;;  %v1093_v9 = vld [vmem:[%s2446_s0 + $0x18] sm:$0xf] }
  0x40   :  { %695 = vmatpush.bf16.msrb.mxu0 %v1678_v19  ;;  %v190_v19 = vld [vmem:[%s2445_s1 + $0x310] sm:$0xff] }
  0x41   :  { %v245_v30 = vpack.c.bf16 %v191_v27, %v190_v19  ;;  %v1267_v19 = vld [vmem:[%s2446_s0 + $0x1a4] sm:$0xf0] }
  0x43   :  { %657 = vmatmul.bf16.gmra.mxu3 %v1182_v15  ;;  %696 = vmatmul.bf16.vlgmr.msrb.gmra.mxu0 %v1074_v20  ;;  %v1409_v15 = vld [vmem:[%s2446_s0 + $0x1a0] sm:$0xf0]  ;;  %v1105_v20 = vld [vmem:[%s2446_s0 + $0x40] sm:$0xf] }
  0x44   :  { %747 = vmatpush.bf16.msra.mxu0 %v1484_v7  ;;  %v223_v7 = vpack.c.bf16 %v147_v24, %v146_v23  ;;  %989 = vmatpush.bf16.msrb.mxu2 %v245_v30  ;;  %v1410_v23 = vld [vmem:[%s2446_s0 + $0x1a8] sm:$0xf0]  ;;  %v1266_v27 = vor.u32 %v1409_v15, %v1265_v14 }
  0x45   :  { %775 = vmatmul.bf16.gmra.mxu2 %v1190_v21  ;;  %716 = vmatmul.bf16.gmra.mxu1 %v1186_v22  ;;  %v1368_v21 = vld [vmem:[%s2446_s0 + $0x58] sm:$0xf0]  ;;  %v1273_v22 = vld [vmem:[%s2446_s0 + $0x190] sm:$0xf]  ;;  %v1406_v24 = vld [vmem:[%s2446_s0 + $0x18c] sm:$0xf] }
  0x46   :  { %810 = vmatpush.bf16.msrb.mxu3 %v223_v7  ;;  %v232_v7 = vpack.c.bf16 %v165_v13, %v164_v12  ;;  %v1106_v28 = vor.u32 %v1368_v21, %v1105_v20  ;;  %v1274_v29 = vor.u32 %v1410_v23, %v1273_v22  ;;  %v1270_v30 = vor.u32 %v1406_v24, %v1267_v19  ;;  %v1141_v20 = vld [vmem:[%s2446_s0 + $0x80] sm:$0xf]  ;;  %v1376_v21 = vld [vmem:[%s2446_s0 + $0x98] sm:$0xf0] }
  0x47   :  { %v1094_v13 = vor.u32 %v1363_v53, %v1093_v9  ;;  %v1142_v22 = vor.u32 %v1376_v21, %v1141_v20 }
  0x48   :  { %748 = vmatpush.bf16.msra.mxu0 %v1508_v16  ;;  %v1209_v16 = vld [vmem:[%s2446_s0 + $0x118] sm:$0xf]  ;;  %990 = vmatpush.bf16.msrb.mxu2 %v244_v44  ;;  %v1358_v44 = vld [vmem:[%s2446_s0 + $0xc] sm:$0xf] }
  0x49   :  { %v1210_v40 = vor.u32 %v1395_v32, %v1209_v16  ;;  %v163_v16 = vld [vmem:[%s2445_s1 + $0x238] sm:$0xff] }
  0x4a   :  { %v231_v32 = vpack.c.bf16 %v163_v16, %v162_v31  ;;  %v1121_v31 = vld [vmem:[%s2446_s0 + $0x50] sm:$0xf]  ;;  %v1370_v16 = vld [vmem:[%s2446_s0 + $0x68] sm:$0xf0] }
  0x4c   :  { %749 = vmatpush.bf16.msra.mxu0 %v1532_v25  ;;  %v1217_v25 = vld [vmem:[%s2446_s0 + $0x120] sm:$0xf] }
  0x4d   :  { %v1218_v42 = vor.u32 %v1396_v37, %v1217_v25  ;;  %v160_v25 = vld [vmem:[%s2445_s1 + $0x220] sm:$0xff]  ;;  %v220_v37 = vpack.c.bf16 %v141_v36, %v140_v33  ;;  %v1115_v33 = vld [vmem:[%s2446_s0 + $0x64] sm:$0xf0] }
  0x50   :  { %750 = vmatpush.bf16.msra.mxu0 %v1556_v34  ;;  %v144_v34 = vld [vmem:[%s2445_s1 + $0x1a0] sm:$0xff] }
  0x51   :  { %v222_v47 = vpack.c.bf16 %v145_v45, %v144_v34 }
  0x53   :  { %662 = vmatmul.bf16.gmra.mxu3 %v1210_v40  ;;  %701 = vmatmul.bf16.gmra.mxu0 %v1102_v41  ;;  %v230_v40 = vpack.c.bf16 %v161_v38, %v160_v25  ;;  %v159_v41 = vld [vmem:[%s2445_s1 + $0x218] sm:$0xff] }
  0x54   :  { %751 = vmatpush.bf16.msra.mxu0 %v1580_v43  ;;  %v177_v43 = vld [vmem:[%s2445_s1 + $0x2a8] sm:$0xff]  ;;  %811 = vmatpush.bf16.msrb.mxu3 %v222_v47  ;;  %v229_v45 = vpack.c.bf16 %v159_v41, %v158_v39  ;;  %v1416_v47 = vld [vmem:[%s2446_s0 + $0x1d8] sm:$0xf0] }
  0x55   :  { %780 = vmatmul.bf16.gmra.mxu2 %v1218_v42  ;;  %721 = vmatmul.bf16.gmra.mxu1 %v1214_v8  ;;  %v238_v48 = vpack.c.bf16 %v177_v43, %v176_v46  ;;  %v172_v42 = vld [vmem:[%s2445_s1 + $0x280] sm:$0xff]  ;;  %v173_v8 = vld [vmem:[%s2445_s1 + $0x288] sm:$0xff] }
  0x56   :  { %v236_v34 = vpack.c.bf16 %v173_v8, %v172_v42  ;;  %v1293_v46 = vld [vmem:[%s2446_s0 + $0x1c0] sm:$0xf]  ;;  %v1301_v43 = vld [vmem:[%s2446_s0 + $0x1c8] sm:$0xf] }
  0x57   :  { %929 = vmatpush.bf16.msrb.mxu1 %v238_v48  ;;  %v1417_v48 = vld [vmem:[%s2446_s0 + $0x1e0] sm:$0xf0] }
  0x58   :  { %752 = vmatpush.bf16.msra.mxu0 %v1604_v52  ;;  %v1077_v52 = vld [vmem:[%s2446_s0 + $0x8] sm:$0xf]  ;;  %812 = vmatpush.bf16.msrb.mxu3 %v221_v2  ;;  %v1302_v17 = vor.u32 %v1417_v48, %v1301_v43 }
  0x59   :  { %v1078_v57 = vor.u32 %v1361_v51, %v1077_v52  ;;  %v156_v52 = vld [vmem:[%s2445_s1 + $0x200] sm:$0xff]  ;;  %v157_v51 = vld [vmem:[%s2445_s1 + $0x208] sm:$0xff] }
  0x5b   :  { %930 = vmatpush.bf16.msrb.mxu1 %v237_v11  ;;  %v1087_v11 = vld [vmem:[%s2446_s0 + $0x2c] sm:$0xf0] }
  0x5c   :  { %753 = vmatpush.bf16.msra.mxu0 %v1634_v63  ;;  %v1245_v63 = vld [vmem:[%s2446_s0 + $0x158] sm:$0xf]  ;;  %813 = vmatpush.bf16.msrb.mxu3 %v220_v37  ;;  %v1090_v14 = vor.u32 %v1359_v10, %v1087_v11  ;;  %v1379_v10 = vld [vmem:[%s2446_s0 + $0xb4] sm:$0xf]  ;;  %v1163_v11 = vld [vmem:[%s2446_s0 + $0xcc] sm:$0xf0] }
  0x5d   :  { %v1246_v26 = vor.u32 %v1403_v54, %v1245_v63  ;;  %v1294_v63 = vor.u32 %v1416_v47, %v1293_v46  ;;  %v228_v54 = vpack.c.bf16 %v157_v51, %v156_v52  ;;  %v1372_v51 = vld [vmem:[%s2446_s0 + $0x7c] sm:$0xf] }
  0x5f   :  { %931 = vmatpush.bf16.msrb.mxu1 %v236_v34  ;;  %v1169_v34 = vld [vmem:[%s2446_s0 + $0xb8] sm:$0xf] }
  0x60   :  { %754 = vmatpush.bf16.msra.mxu0 %v1676_v18  ;;  %v170_v18 = vld [vmem:[%s2445_s1 + $0x270] sm:$0xff] }
  0x61   :  { %v235_v60 = vpack.c.bf16 %v171_v59, %v170_v18  ;;  %v1423_v18 = vld [vmem:[%s2446_s0 + $0x210] sm:$0xf0]  ;;  %v1329_v59 = vld [vmem:[%s2446_s0 + $0x200] sm:$0xf] }
  0x63   :  { %667 = vmatmul.bf16.gmra.mxu3 %v1238_v56  ;;  %755 = vmatmul.bf16.vlgmr.msra.gmra.mxu0 %v1078_v57  ;;  %v1085_v56 = vld [vmem:[%s2446_s0 + $0x10] sm:$0xf]  ;;  %v1362_v57 = vld [vmem:[%s2446_s0 + $0x28] sm:$0xf0] }
  0x64   :  { %865 = vmatpush.bf16.msrb.mxu0 %v235_v60  ;;  %v1424_v60 = vld [vmem:[%s2446_s0 + $0x218] sm:$0xf0] }
  0x65   :  { %785 = vmatmul.bf16.gmra.mxu2 %v1246_v26  ;;  %726 = vmatmul.bf16.gmra.mxu1 %v1242_v58  ;;  %v1086_v26 = vor.u32 %v1362_v57, %v1085_v56  ;;  %v1321_v58 = vld [vmem:[%s2446_s0 + $0x1f8] sm:$0xf]  ;;  %v1330_v2 = vor.u32 %v1424_v60, %v1329_v59  ;;  %v1143_v56 = vld [vmem:[%s2446_s0 + $0x9c] sm:$0xf0] }
  0x66   :  { %v1322_v1 = vor.u32 %v1423_v18, %v1321_v58 }
  0x68   :  { %866 = vmatpush.bf16.msrb.mxu0 %v234_v35  ;;  %v1114_v35 = vor.u32 %v1369_v5, %v1113_v4 }
  0x6c   :  { %867 = vmatpush.bf16.msrb.mxu0 %v233_v0  ;;  %v1082_v0 = vor.u32 %v1358_v44, %v1079_v6 }
  0x70   :  { %868 = vmatpush.bf16.msrb.mxu0 %v232_v7 }
  0x73   :  { %672 = vmatmul.bf16.gmra.mxu3 %v1266_v27  ;;  %760 = vmatmul.bf16.gmra.mxu0 %v1106_v28 }
  0x74   :  { %869 = vmatpush.bf16.msrb.mxu0 %v231_v32  ;;  %v1366_v32 = vld [vmem:[%s2446_s0 + $0x4c] sm:$0xf] }
  0x75   :  { %790 = vmatmul.bf16.gmra.mxu2 %v1274_v29  ;;  %731 = vmatmul.bf16.gmra.mxu1 %v1270_v30  ;;  %v1365_v29 = vld [vmem:[%s2446_s0 + $0x44] sm:$0xf]  ;;  %v1107_v30 = vld [vmem:[%s2446_s0 + $0x5c] sm:$0xf0]  ;;  %v1118_v41 = vor.u32 %v1366_v32, %v1115_v33 }
  0x76   :  { %v1110_v38 = vor.u32 %v1365_v29, %v1107_v30 }
  0x78   :  { %870 = vmatpush.bf16.msrb.mxu0 %v230_v40  ;;  %v1122_v40 = vor.u32 %v1370_v16, %v1121_v31  ;;  %v1225_v31 = vld [vmem:[%s2446_s0 + $0x128] sm:$0xf]  ;;  %v1397_v16 = vld [vmem:[%s2446_s0 + $0x140] sm:$0xf0] }
  0x79   :  { %v1226_v32 = vor.u32 %v1397_v16, %v1225_v31 }
  0x7c   :  { %871 = vmatpush.bf16.msrb.mxu0 %v229_v45  ;;  %v1383_v45 = vld [vmem:[%s2446_s0 + $0xd0] sm:$0xf0] }
  0x7d   :  { %v1170_v46 = vor.u32 %v1383_v45, %v1169_v34  ;;  %v1205_v34 = vld [vmem:[%s2446_s0 + $0xf8] sm:$0xf]  ;;  %v1391_v45 = vld [vmem:[%s2446_s0 + $0x110] sm:$0xf0] }
  0x80   :  { %872 = vmatpush.bf16.msrb.mxu0 %v228_v54  ;;  %v1149_v54 = vld [vmem:[%s2446_s0 + $0x88] sm:$0xf] }
  0x83   :  { %677 = vmatmul.bf16.gmra.mxu3 %v1294_v63  ;;  %873 = vmatmul.bf16.vlgmr.msrb.gmra.mxu0 %v1086_v26  ;;  %v1135_v63 = vld [vmem:[%s2446_s0 + $0x94] sm:$0xf0] }
  0x84   :  { %v1138_v18 = vor.u32 %v1372_v51, %v1135_v63 }
  0x85   :  { %795 = vmatmul.bf16.gmra.mxu2 %v1302_v17  ;;  %736 = vmatmul.bf16.gmra.mxu1 %v1298_v55  ;;  %v1377_v17 = vld [vmem:[%s2446_s0 + $0xa0] sm:$0xf0] }
  0x86   :  { %v1373_v55 = vld [vmem:[%s2446_s0 + $0x84] sm:$0xf]  ;;  %v1150_v60 = vor.u32 %v1377_v17, %v1149_v54  ;;  %v1206_v54 = vor.u32 %v1391_v45, %v1205_v34 }
  0x87   :  { %v1146_v61 = vor.u32 %v1373_v55, %v1143_v56  ;;  %v1405_v34 = vld [vmem:[%s2446_s0 + $0x180] sm:$0xf0] }
  0x88   :  { %v1401_v45 = vld [vmem:[%s2446_s0 + $0x164] sm:$0xf] }
  0x93   :  { %682 = vmatmul.bf16.gmra.mxu3 %v1322_v1  ;;  %878 = vmatmul.bf16.gmra.mxu0 %v1114_v35 }
  0x95   :  { %800 = vmatmul.bf16.gmra.mxu2 %v1330_v2  ;;  %741 = vmatmul.bf16.gmra.mxu1 %v1326_v3  ;;  %v1197_v2 = vld [vmem:[%s2446_s0 + $0xf0] sm:$0xf]  ;;  %v1390_v3 = vld [vmem:[%s2446_s0 + $0x108] sm:$0xf0] }
  0x96   :  { %v1198_v4 = vor.u32 %v1390_v3, %v1197_v2 }
  0xa0   :  { %v2052_v12 = vpop.f32.mrf.mxu0 }
  0xa2   :  { %v707_v15 = vpop.f32.mrf.mxu1 }
  0xa3   :  { %814 = vmatmul.bf16.vlgmr.msrb.gmra.mxu3 %v1082_v0  ;;  %883 = vmatmul.bf16.gmra.mxu0 %v1142_v22  ;;  %v1177_v0 = vld [vmem:[%s2446_s0 + $0xc0] sm:$0xf] }
  0xa5   :  { %1347 = vmatmul.msk.bf16.vlgmr.msrb.gmra.mxu2 %vm598_vm0, %v1094_v13  ;;  %932 = vmatmul.bf16.vlgmr.msrb.gmra.mxu1 %v1090_v14  ;;  %v1384_v13 = vld [vmem:[%s2446_s0 + $0xd8] sm:$0xf0] }
  0xa6   :  { %v648_v23 = vpop.f32.mrf.mxu3  ;;  %v1380_v14 = vld [vmem:[%s2446_s0 + $0xbc] sm:$0xf] }
  0xa7   :  { %v708_v24 = vadd.f32 %v707_v15, %v648_v23  ;;  %v1171_v15 = vld [vmem:[%s2446_s0 + $0xd4] sm:$0xf0]  ;;  %v1166_v23 = vor.u32 %v1379_v10, %v1163_v11  ;;  %v1227_v10 = vld [vmem:[%s2446_s0 + $0x144] sm:$0xf0] }
  0xa8   :  { %v766_v19 = vpop.f32.mrf.mxu2  ;;  %v2061_v7 = vpop.f32.mrf.mxu0 }
  0xa9   :  { %v2063_v27 = vadd.f32 %v766_v19, %v708_v24  ;;  %v1178_v19 = vor.u32 %v1384_v13, %v1177_v0 }
  0xaa   :  { %v709_v28 = vpop.f32.mrf.mxu1 }
  0xae   :  { %v650_v36 = vpop.f32.mrf.mxu3 }
  0xaf   :  { %v710_v25 = vadd.f32 %v709_v28, %v650_v36  ;;  %v1174_v28 = vor.u32 %v1380_v14, %v1171_v15 }
  0xb0   :  { %v768_v37 = vpop.f32.mrf.mxu2  ;;  %v2083_v39 = vpop.f32.mrf.mxu0 }
  0xb1   :  { %v2085_v42 = vadd.f32 %v768_v37, %v710_v25 }
  0xb2   :  { %v712_v8 = vpop.f32.mrf.mxu1 }
  0xb3   :  { %819 = vmatmul.bf16.gmra.mxu3 %v1110_v38  ;;  %888 = vmatmul.bf16.gmra.mxu0 %v1170_v46  ;;  %v1387_v46 = vld [vmem:[%s2446_s0 + $0xf4] sm:$0xf] }
  0xb5   :  { %1348 = vmatmul.msk.bf16.gmra.mxu2 %vm598_vm0, %v1122_v40  ;;  %937 = vmatmul.bf16.gmra.mxu1 %v1118_v41  ;;  %v1386_v41 = vld [vmem:[%s2446_s0 + $0xec] sm:$0xf] }
  0xb6   :  { %v653_v47 = vpop.f32.mrf.mxu3 }
  0xb7   :  { %v713_v43 = vadd.f32 %v712_v8, %v653_v47  ;;  %v1191_v8 = vld [vmem:[%s2446_s0 + $0x104] sm:$0xf0]  ;;  %v1199_v47 = vld [vmem:[%s2446_s0 + $0x10c] sm:$0xf0] }
  0xb8   :  { %v771_v48 = vpop.f32.mrf.mxu2  ;;  %v2094_v49 = vpop.f32.mrf.mxu0  ;;  %v1194_v51 = vor.u32 %v1386_v41, %v1191_v8  ;;  %v1202_v17 = vor.u32 %v1387_v46, %v1199_v47  ;;  %v1247_v41 = vld [vmem:[%s2446_s0 + $0x174] sm:$0xf0]  ;;  %v1261_v8 = vld [vmem:[%s2446_s0 + $0x168] sm:$0xf]  ;;  %v1255_v46 = vld [vmem:[%s2446_s0 + $0x17c] sm:$0xf0] }
  0xb9   :  { %v2096_v50 = vadd.f32 %v771_v48, %v713_v43 }
  0xba   :  { %v714_v52 = vpop.f32.mrf.mxu1 }
  0xbe   :  { %v655_v57 = vpop.f32.mrf.mxu3 }
  0xbf   :  { %v715_v26 = vadd.f32 %v714_v52, %v655_v57  ;;  %v1253_v57 = vld [vmem:[%s2446_s0 + $0x160] sm:$0xf] }
  0xc0   :  { %v773_v58 = vpop.f32.mrf.mxu2  ;;  %v2116_v59 = vpop.f32.mrf.mxu0 }
  0xc1   :  { %v2118_v62 = vadd.f32 %v773_v58, %v715_v26  ;;  %v1404_v26 = vld [vmem:[%s2446_s0 + $0x178] sm:$0xf0] }
  0xc2   :  { %v717_v1 = vpop.f32.mrf.mxu1  ;;  %v1254_v58 = vor.u32 %v1404_v26, %v1253_v57  ;;  %v1309_v57 = vld [vmem:[%s2446_s0 + $0x1d0] sm:$0xf] }
  0xc3   :  { %824 = vmatmul.bf16.gmra.mxu3 %v1138_v18  ;;  %893 = vmatmul.bf16.gmra.mxu0 %v1198_v4  ;;  %v1393_v4 = vld [vmem:[%s2446_s0 + $0x124] sm:$0xf] }
  0xc5   :  { %1349 = vmatmul.msk.bf16.gmra.mxu2 %vm598_vm0, %v1150_v60  ;;  %942 = vmatmul.bf16.gmra.mxu1 %v1146_v61 }
  0xc6   :  { %v658_v5 = vpop.f32.mrf.mxu3 }
  0xc7   :  { %v718_v35 = vadd.f32 %v717_v1, %v658_v5  ;;  %v1219_v5 = vld [vmem:[%s2446_s0 + $0x13c] sm:$0xf0] }
  0xc8   :  { %v776_v44 = vpop.f32.mrf.mxu2  ;;  %v2127_v6 = vpop.f32.mrf.mxu0  ;;  %v1222_v14 = vor.u32 %v1393_v4, %v1219_v5 }
  0xc9   :  { %v2129_v9 = vadd.f32 %v776_v44, %v718_v35  ;;  %v1233_v35 = vld [vmem:[%s2446_s0 + $0x130] sm:$0xf]  ;;  %v1398_v44 = vld [vmem:[%s2446_s0 + $0x148] sm:$0xf0] }
  0xca   :  { %v719_v53 = vpop.f32.mrf.mxu1 }
  0xce   :  { %v660_v20 = vpop.f32.mrf.mxu3 }
  0xcf   :  { %v720_v21 = vadd.f32 %v719_v53, %v660_v20  ;;  %v1394_v53 = vld [vmem:[%s2446_s0 + $0x12c] sm:$0xf]  ;;  %v1234_v20 = vor.u32 %v1398_v44, %v1233_v35  ;;  %v1407_v35 = vld [vmem:[%s2446_s0 + $0x194] sm:$0xf]  ;;  %v1275_v44 = vld [vmem:[%s2446_s0 + $0x1ac] sm:$0xf0] }
  0xd0   :  { %v778_v22 = vpop.f32.mrf.mxu2  ;;  %v2149_v24 = vpop.f32.mrf.mxu0 }
  0xd1   :  { %v2151_v29 = vadd.f32 %v778_v22, %v720_v21  ;;  %v1230_v21 = vor.u32 %v1394_v53, %v1227_v10  ;;  %v1289_v53 = vld [vmem:[%s2446_s0 + $0x1a0] sm:$0xf] }
  0xd2   :  { %v722_v30 = vpop.f32.mrf.mxu1 }
  0xd3   :  { %829 = vmatmul.bf16.gmra.mxu3 %v1166_v23  ;;  %898 = vmatmul.bf16.gmra.mxu0 %v1226_v32 }
  0xd5   :  { %1350 = vmatmul.msk.bf16.gmra.mxu2 %vm598_vm0, %v1178_v19  ;;  %947 = vmatmul.bf16.gmra.mxu1 %v1174_v28  ;;  %v1281_v19 = vld [vmem:[%s2446_s0 + $0x198] sm:$0xf]  ;;  %v1411_v28 = vld [vmem:[%s2446_s0 + $0x1b0] sm:$0xf0] }
  0xd6   :  { %v663_v33 = vpop.f32.mrf.mxu3 }
  0xd7   :  { %v723_v36 = vadd.f32 %v722_v30, %v663_v33  ;;  %v1282_v30 = vor.u32 %v1411_v28, %v1281_v19 }
  0xd8   :  { %v781_v25 = vpop.f32.mrf.mxu2  ;;  %v2160_v37 = vpop.f32.mrf.mxu0 }
  0xd9   :  { %v2162_v38 = vadd.f32 %v781_v25, %v723_v36 }
  0xda   :  { %v724_v40 = vpop.f32.mrf.mxu1 }
  0xde   :  { %v665_v43 = vpop.f32.mrf.mxu3 }
  0xdf   :  { %v725_v48 = vadd.f32 %v724_v40, %v665_v43  ;;  %v1400_v40 = vld [vmem:[%s2446_s0 + $0x15c] sm:$0xf] }
  0xe0   :  { %v783_v52 = vpop.f32.mrf.mxu2  ;;  %v2182_v63 = vpop.f32.mrf.mxu0 }
  0xe1   :  { %v2184_v55 = vadd.f32 %v783_v52, %v725_v48  ;;  %v1250_v52 = vor.u32 %v1400_v40, %v1247_v41 }
  0xe2   :  { %v727_v56 = vpop.f32.mrf.mxu1 }
  0xe3   :  { %834 = vmatmul.bf16.gmra.mxu3 %v1194_v51  ;;  %903 = vmatmul.bf16.gmra.mxu0 %v1254_v58  ;;  %v1262_v51 = vor.u32 %v1405_v34, %v1261_v8  ;;  %v1418_v58 = vld [vmem:[%s2446_s0 + $0x1e8] sm:$0xf0] }
  0xe5   :  { %1351 = vmatmul.msk.bf16.gmra.mxu2 %vm598_vm0, %v1206_v54  ;;  %952 = vmatmul.bf16.gmra.mxu1 %v1202_v17  ;;  %v1258_v54 = vor.u32 %v1401_v45, %v1255_v46 }
  0xe6   :  { %v668_v18 = vpop.f32.mrf.mxu3 }
  0xe7   :  { %v728_v60 = vadd.f32 %v727_v56, %v668_v18  ;;  %v1310_v18 = vor.u32 %v1418_v58, %v1309_v57 }
  0xe8   :  { %v786_v61 = vpop.f32.mrf.mxu2  ;;  %v2193_v1 = vpop.f32.mrf.mxu0 }
  0xe9   :  { %v2195_v2 = vadd.f32 %v786_v61, %v728_v60 }
  0xea   :  { %v729_v3 = vpop.f32.mrf.mxu1 }
  0xee   :  { %v670_v11 = vpop.f32.mrf.mxu3 }
  0xef   :  { %v730_v0 = vadd.f32 %v729_v3, %v670_v11  ;;  %v1412_v11 = vld [vmem:[%s2446_s0 + $0x1b8] sm:$0xf0] }
  0xf0   :  { %v788_v13 = vpop.f32.mrf.mxu2  ;;  %v2215_v15 = vpop.f32.mrf.mxu0  ;;  %v1290_v19 = vor.u32 %v1412_v11, %v1289_v53 }
  0xf1   :  { %v2217_v22 = vadd.f32 %v788_v13, %v730_v0  ;;  %v1408_v0 = vld [vmem:[%s2446_s0 + $0x19c] sm:$0xf]  ;;  %v1283_v13 = vld [vmem:[%s2446_s0 + $0x1b4] sm:$0xf0] }
  0xf2   :  { %v732_v23 = vpop.f32.mrf.mxu1  ;;  %v1286_v28 = vor.u32 %v1408_v0, %v1283_v13 }
  0xf3   :  { %839 = vmatmul.bf16.gmra.mxu3 %v1222_v14  ;;  %908 = vmatmul.bf16.gmra.mxu0 %v1282_v30 }
  0xf5   :  { %1352 = vmatmul.msk.bf16.gmra.mxu2 %vm598_vm0, %v1234_v20  ;;  %957 = vmatmul.bf16.gmra.mxu1 %v1230_v21 }
  0xf6   :  { %v673_v31 = vpop.f32.mrf.mxu3 }
  0xf7   :  { %v733_v16 = vadd.f32 %v732_v23, %v673_v31  ;;  %v1278_v23 = vor.u32 %v1407_v35, %v1275_v44  ;;  %v698_v44 = vadd.f32 %v2116_v59, %v2052_v12  ;;  %v1421_v12 = vld [vmem:[%s2446_s0 + $0x204] sm:$0xf]  ;;  %v1331_v59 = vld [vmem:[%s2446_s0 + $0x21c] sm:$0xf0] }
  0xf8   :  { %v791_v32 = vpop.f32.mrf.mxu2  ;;  %v2228_v25 = vpop.f32.mrf.mxu0 }
  0xf9   :  { %v2226_v33 = vadd.f32 %v791_v32, %v733_v16  ;;  %v1337_v16 = vld [vmem:[%s2446_s0 + $0x208] sm:$0xf]  ;;  %v1425_v32 = vld [vmem:[%s2446_s0 + $0x220] sm:$0xf0]  ;;  %v757_v53 = vadd.f32 %v2182_v63, %v698_v44  ;;  %v1345_v63 = vld [vmem:[%s2446_s0 + $0x210] sm:$0xf] }
  0xfa   :  { %v734_v36 = vpop.f32.mrf.mxu1 }
  0xfe   :  { %v675_v47 = vpop.f32.mrf.mxu3 }
  0xff   :  { %v735_v43 = vadd.f32 %v734_v36, %v675_v47  ;;  %v1338_v36 = vor.u32 %v1425_v32, %v1337_v16  ;;  %v1414_v47 = vld [vmem:[%s2446_s0 + $0x1cc] sm:$0xf] }
 0x100   :  { %v793_v48 = vpop.f32.mrf.mxu2  ;;  %v2253_v26 = vpop.f32.mrf.mxu0 }
 0x101   :  { %v2248_v17 = vadd.f32 %v793_v48, %v735_v43  ;;  %v1303_v43 = vld [vmem:[%s2446_s0 + $0x1e4] sm:$0xf0]  ;;  %v1317_v48 = vld [vmem:[%s2446_s0 + $0x1d8] sm:$0xf] }
 0x102   :  { %v737_v56 = vpop.f32.mrf.mxu1 }
 0x103   :  { %844 = vmatmul.bf16.gmra.mxu3 %v1250_v52  ;;  %913 = vmatmul.bf16.gmra.mxu0 %v1310_v18  ;;  %v1419_v52 = vld [vmem:[%s2446_s0 + $0x1f0] sm:$0xf0]  ;;  %v1306_v18 = vor.u32 %v1414_v47, %v1303_v43  ;;  %v703_v47 = vadd.f32 %v2149_v24, %v2083_v39  ;;  %v705_v24 = vadd.f32 %v2160_v37, %v2094_v49 }
 0x105   :  { %1353 = vmatmul.msk.bf16.gmra.mxu2 %vm598_vm0, %v1262_v51  ;;  %962 = vmatmul.bf16.gmra.mxu1 %v1258_v54  ;;  %v1415_v51 = vld [vmem:[%s2446_s0 + $0x1d4] sm:$0xf]  ;;  %v1311_v54 = vld [vmem:[%s2446_s0 + $0x1ec] sm:$0xf0] }
 0x106   :  { %v678_v60 = vpop.f32.mrf.mxu3 }
 0x107   :  { %v738_v61 = vadd.f32 %v737_v56, %v678_v60  ;;  %v1318_v60 = vor.u32 %v1419_v52, %v1317_v48  ;;  %v762_v52 = vadd.f32 %v2215_v15, %v703_v47 }
 0x108   :  { %v796_v3 = vpop.f32.mrf.mxu2  ;;  %v2270_v10 = vpop.f32.mrf.mxu0 }
 0x109   :  { %v2259_v4 = vadd.f32 %v796_v3, %v738_v61  ;;  %v1314_v61 = vor.u32 %v1415_v51, %v1311_v54 }
 0x10a   :  { %v739_v5 = vpop.f32.mrf.mxu1 }
 0x10e   :  { %v680_v14 = vpop.f32.mrf.mxu3 }
 0x10f   :  { %v740_v20 = vadd.f32 %v739_v5, %v680_v14 }
 0x110   :  { %v798_v21 = vpop.f32.mrf.mxu2  ;;  %v2290_v41 = vpop.f32.mrf.mxu0 }
 0x111   :  { %v2281_v30 = vadd.f32 %v798_v21, %v740_v20 }
 0x112   :  { %v742_v31 = vpop.f32.mrf.mxu1 }
 0x113   :  { %849 = vmatmul.bf16.gmra.mxu3 %v1278_v23  ;;  %918 = vmatmul.bf16.gmra.mxu0 %v1338_v36  ;;  %v700_v23 = vadd.f32 %v2127_v6, %v2061_v7  ;;  %v1426_v7 = vld [vmem:[%s2446_s0 + $0x228] sm:$0xf0]  ;;  %v1334_v36 = vor.u32 %v1421_v12, %v1331_v59 }
 0x114   :  { %v1422_v6 = vld [vmem:[%s2446_s0 + $0x20c] sm:$0xf] }
 0x115   :  { %1354 = vmatmul.msk.bf16.gmra.mxu2 %vm598_vm0, %v1290_v19  ;;  %967 = vmatmul.bf16.gmra.mxu1 %v1286_v28 }
 0x116   :  { %v683_v40 = vpop.f32.mrf.mxu3 }
 0x117   :  { %v743_v8 = vadd.f32 %v742_v31, %v683_v40  ;;  %v1339_v31 = vld [vmem:[%s2446_s0 + $0x224] sm:$0xf0]  ;;  %v1346_v40 = vor.u32 %v1426_v7, %v1345_v63 }
 0x118   :  { %v801_v34 = vpop.f32.mrf.mxu2  ;;  %v881_v3 = vpop.f32.mrf.mxu0 }
 0x119   :  { %v2292_v45 = vadd.f32 %v801_v34, %v743_v8  ;;  %v1342_v8 = vor.u32 %v1422_v6, %v1339_v31 }
 0x11a   :  { %v744_v46 = vpop.f32.mrf.mxu1 }
 0x11e   :  { %v685_v56 = vpop.f32.mrf.mxu3 }
 0x11f   :  { %v745_v57 = vadd.f32 %v744_v46, %v685_v56 }
 0x120   :  { %v803_v58 = vpop.f32.mrf.mxu2  ;;  %v884_v21 = vpop.f32.mrf.mxu0 }
 0x121   :  { %v2312_v5 = vadd.f32 %v803_v58, %v745_v57 }
 0x122   :  { %v933_v35 = vpop.f32.mrf.mxu1 }
 0x123   :  { %854 = vmatmul.bf16.gmra.mxu3 %v1306_v18  ;;  %v764_v18 = vadd.f32 %v2228_v25, %v705_v24 }
 0x125   :  { %1355 = vmatmul.msk.bf16.gmra.mxu2 %vm598_vm0, %v1318_v60  ;;  %972 = vmatmul.bf16.gmra.mxu1 %v1314_v61 }
 0x126   :  { %v815_v11 = vpop.f32.mrf.mxu3 }
 0x127   :  { %v816_v0 = vadd.f32 %v815_v11, %v757_v53 }
 0x128   :  { %v992_v13 = vpop.f32.mrf.mxu2  ;;  %v886_v48 = vpop.f32.mrf.mxu0 }
 0x129   :  { %v875_v14 = vadd.f32 %v2253_v26, %v816_v0  ;;  %v759_v26 = vadd.f32 %v2193_v1, %v700_v23 }
 0x12a   :  { %v935_v20 = vpop.f32.mrf.mxu1 }
 0x12b   :  { %v934_v19 = vadd.f32 %v933_v35, %v875_v14 }
 0x12d   :  { %v993_v28 = vadd.f32 %v992_v13, %v934_v19 }
 0x12e   :  { %v817_v16 = vpop.f32.mrf.mxu3 }
 0x12f   :  { %1043 = vst.msk [vmem:[%s2447_s2] sm:$0xff] %vm1042_vm1, %v993_v28  ;;  %v818_v1 = vadd.f32 %v817_v16, %v759_v26 }
 0x130   :  { %v994_v32 = vpop.f32.mrf.mxu2  ;;  %v889_v61 = vpop.f32.mrf.mxu0 }
 0x131   :  { %v877_v34 = vadd.f32 %v2270_v10, %v818_v1 }
 0x132   :  { %v938_v46 = vpop.f32.mrf.mxu1 }
 0x133   :  { %v936_v43 = vadd.f32 %v935_v20, %v877_v34  ;;  %859 = vmatmul.bf16.gmra.mxu3 %v1334_v36 }
 0x135   :  { %1356 = vmatmul.msk.bf16.gmra.mxu2 %vm598_vm0, %v1346_v40  ;;  %977 = vmatmul.bf16.gmra.mxu1 %v1342_v8  ;;  %v995_v51 = vadd.f32 %v994_v32, %v936_v43 }
 0x136   :  { %v820_v54 = vpop.f32.mrf.mxu3 }
 0x137   :  { %1044 = vst.msk [vmem:[%s2447_s2 + $0x8] sm:$0xff] %vm1042_vm1, %v995_v51  ;;  %v821_v10 = vadd.f32 %v820_v54, %v762_v52 }
 0x138   :  { %v997_v56 = vpop.f32.mrf.mxu2  ;;  %v891_v25 = vpop.f32.mrf.mxu0 }
 0x139   :  { %v880_v57 = vadd.f32 %v2290_v41, %v821_v10 }
 0x13a   :  { %v940_v39 = vpop.f32.mrf.mxu1 }
 0x13b   :  { %v939_v58 = vadd.f32 %v938_v46, %v880_v57 }
 0x13d   :  { %v998_v60 = vadd.f32 %v997_v56, %v939_v58 }
 0x13e   :  { %v822_v15 = vpop.f32.mrf.mxu3 }
 0x13f   :  { %1045 = vst.msk [vmem:[%s2447_s2 + $0x10] sm:$0xff] %vm1042_vm1, %v998_v60  ;;  %v823_v35 = vadd.f32 %v822_v15, %v764_v18 }
 0x140   :  { %v999_v44 = vpop.f32.mrf.mxu2  ;;  %v894_v28 = vpop.f32.mrf.mxu0 }
 0x141   :  { %v882_v53 = vadd.f32 %v881_v3, %v823_v35 }
 0x142   :  { %v943_v11 = vpop.f32.mrf.mxu1 }
 0x143   :  { %v941_v41 = vadd.f32 %v940_v39, %v882_v53 }
 0x145   :  { %v1000_v0 = vadd.f32 %v999_v44, %v941_v41 }
 0x146   :  { %v825_v13 = vpop.f32.mrf.mxu3 }
 0x147   :  { %1046 = vst.msk [vmem:[%s2447_s2 + $0x18] sm:$0xff] %vm1042_vm1, %v1000_v0  ;;  %v826_v49 = vadd.f32 %v825_v13, %v2063_v27 }
 0x148   :  { %v1002_v37 = vpop.f32.mrf.mxu2  ;;  %v896_v36 = vpop.f32.mrf.mxu0 }
 0x149   :  { %v885_v14 = vadd.f32 %v884_v21, %v826_v49 }
 0x14a   :  { %v945_v20 = vpop.f32.mrf.mxu1 }
 0x14b   :  { %v944_v23 = vadd.f32 %v943_v11, %v885_v14 }
 0x14d   :  { %v1003_v19 = vadd.f32 %v1002_v37, %v944_v23 }
 0x14e   :  { %v827_v12 = vpop.f32.mrf.mxu3 }
 0x14f   :  { %1047 = vst.msk [vmem:[%s2447_s2 + $0x20] sm:$0xff] %vm1042_vm1, %v1003_v19  ;;  %v828_v3 = vadd.f32 %v827_v12, %v2085_v42 }
 0x150   :  { %v1004_v59 = vpop.f32.mrf.mxu2  ;;  %v899_v52 = vpop.f32.mrf.mxu0 }
 0x151   :  { %v887_v63 = vadd.f32 %v886_v48, %v828_v3 }
 0x152   :  { %v948_v26 = vpop.f32.mrf.mxu1 }
 0x153   :  { %v946_v7 = vadd.f32 %v945_v20, %v887_v63 }
 0x155   :  { %v1005_v27 = vadd.f32 %v1004_v59, %v946_v7 }
 0x156   :  { %v830_v6 = vpop.f32.mrf.mxu3 }
 0x157   :  { %1048 = vst.msk [vmem:[%s2447_s2 + $0x28] sm:$0xff] %vm1042_vm1, %v1005_v27  ;;  %v831_v21 = vadd.f32 %v830_v6, %v2096_v50 }
 0x158   :  { %v1007_v31 = vpop.f32.mrf.mxu2  ;;  %v901_v18 = vpop.f32.mrf.mxu0 }
 0x159   :  { %v890_v16 = vadd.f32 %v889_v61, %v831_v21 }
 0x15a   :  { %v950_v1 = vpop.f32.mrf.mxu1 }
 0x15b   :  { %v949_v32 = vadd.f32 %v948_v26, %v890_v16 }
 0x15d   :  { %v1008_v42 = vadd.f32 %v1007_v31, %v949_v32 }
 0x15e   :  { %v832_v40 = vpop.f32.mrf.mxu3 }
 0x15f   :  { %1049 = vst.msk [vmem:[%s2447_s2 + $0x30] sm:$0xff] %vm1042_vm1, %v1008_v42  ;;  %v833_v8 = vadd.f32 %v832_v40, %v2118_v62 }
 0x160   :  { %v1009_v34 = vpop.f32.mrf.mxu2  ;;  %v904_v0 = vpop.f32.mrf.mxu0 }
 0x161   :  { %v892_v46 = vadd.f32 %v891_v25, %v833_v8 }
 0x162   :  { %v953_v47 = vpop.f32.mrf.mxu1 }
 0x163   :  { %v951_v43 = vadd.f32 %v950_v1, %v892_v46 }
 0x165   :  { %v1010_v48 = vadd.f32 %v1009_v34, %v951_v43 }
 0x166   :  { %v835_v50 = vpop.f32.mrf.mxu3 }
 0x167   :  { %1050 = vst.msk [vmem:[%s2447_s2 + $0x38] sm:$0xff] %vm1042_vm1, %v1010_v48  ;;  %v836_v51 = vadd.f32 %v835_v50, %v2129_v9 }
 0x168   :  { %v1012_v54 = vpop.f32.mrf.mxu2  ;;  %v906_v19 = vpop.f32.mrf.mxu0 }
 0x169   :  { %v895_v10 = vadd.f32 %v894_v28, %v836_v51 }
 0x16a   :  { %v955_v56 = vpop.f32.mrf.mxu1 }
 0x16b   :  { %v954_v57 = vadd.f32 %v953_v47, %v895_v10 }
 0x16d   :  { %v1013_v39 = vadd.f32 %v1012_v54, %v954_v57 }
 0x16e   :  { %v837_v62 = vpop.f32.mrf.mxu3 }
 0x16f   :  { %1051 = vst.msk [vmem:[%s2447_s2 + $0x40] sm:$0xff] %vm1042_vm1, %v1013_v39  ;;  %v838_v24 = vadd.f32 %v837_v62, %v2151_v29 }
 0x170   :  { %v1014_v58 = vpop.f32.mrf.mxu2  ;;  %v909_v27 = vpop.f32.mrf.mxu0 }
 0x171   :  { %v897_v60 = vadd.f32 %v896_v36, %v838_v24 }
 0x172   :  { %v958_v15 = vpop.f32.mrf.mxu1 }
 0x173   :  { %v956_v61 = vadd.f32 %v955_v56, %v897_v60 }
 0x175   :  { %v1015_v35 = vadd.f32 %v1014_v58, %v956_v61 }
 0x176   :  { %v840_v9 = vpop.f32.mrf.mxu3 }
 0x177   :  { %1052 = vst.msk [vmem:[%s2447_s2 + $0x48] sm:$0xff] %vm1042_vm1, %v1015_v35  ;;  %v841_v44 = vadd.f32 %v840_v9, %v2162_v38 }
 0x178   :  { %v1017_v53 = vpop.f32.mrf.mxu2  ;;  %v911_v40 = vpop.f32.mrf.mxu0 }
 0x179   :  { %v900_v11 = vadd.f32 %v899_v52, %v841_v44 }
 0x17a   :  { %v960_v41 = vpop.f32.mrf.mxu1 }
 0x17b   :  { %v959_v13 = vadd.f32 %v958_v15, %v900_v11 }
 0x17d   :  { %v1018_v29 = vadd.f32 %v1017_v53, %v959_v13 }
 0x17e   :  { %v842_v49 = vpop.f32.mrf.mxu3 }
 0x17f   :  { %1053 = vst.msk [vmem:[%s2447_s2 + $0x50] sm:$0xff] %vm1042_vm1, %v1018_v29  ;;  %v843_v37 = vadd.f32 %v842_v49, %v2184_v55 }
 0x180   :  { %v1019_v25 = vpop.f32.mrf.mxu2  ;;  %v914_v52 = vpop.f32.mrf.mxu0 }
 0x181   :  { %v902_v14 = vadd.f32 %v901_v18, %v843_v37 }
 0x182   :  { %v963_v20 = vpop.f32.mrf.mxu1 }
 0x183   :  { %v961_v23 = vadd.f32 %v960_v41, %v902_v14 }
 0x185   :  { %v1020_v38 = vadd.f32 %v1019_v25, %v961_v23 }
 0x186   :  { %v845_v12 = vpop.f32.mrf.mxu3 }
 0x187   :  { %1054 = vst.msk [vmem:[%s2447_s2 + $0x58] sm:$0xff] %vm1042_vm1, %v1020_v38  ;;  %v846_v3 = vadd.f32 %v845_v12, %v2195_v2 }
 0x188   :  { %v1022_v59 = vpop.f32.mrf.mxu2  ;;  %v916_v24 = vpop.f32.mrf.mxu0 }
 0x189   :  { %v905_v63 = vadd.f32 %v904_v0, %v846_v3 }
 0x18a   :  { %v965_v26 = vpop.f32.mrf.mxu1 }
 0x18b   :  { %v964_v28 = vadd.f32 %v963_v20, %v905_v63 }
 0x18d   :  { %v1023_v7 = vadd.f32 %v1022_v59, %v964_v28 }
 0x18e   :  { %v847_v55 = vpop.f32.mrf.mxu3 }
 0x18f   :  { %1055 = vst.msk [vmem:[%s2447_s2 + $0x60] sm:$0xff] %vm1042_vm1, %v1023_v7  ;;  %v848_v6 = vadd.f32 %v847_v55, %v2217_v22 }
 0x190   :  { %v1024_v21 = vpop.f32.mrf.mxu2  ;;  %v919_v44 = vpop.f32.mrf.mxu0 }
 0x191   :  { %v907_v31 = vadd.f32 %v906_v19, %v848_v6 }
 0x192   :  { %v968_v16 = vpop.f32.mrf.mxu1 }
 0x193   :  { %v966_v1 = vadd.f32 %v965_v26, %v907_v31 }
 0x195   :  { %v1025_v32 = vadd.f32 %v1024_v21, %v966_v1 }
 0x196   :  { %v850_v2 = vpop.f32.mrf.mxu3 }
 0x197   :  { %1056 = vst.msk [vmem:[%s2447_s2 + $0x68] sm:$0xff] %vm1042_vm1, %v1025_v32  ;;  %v851_v36 = vadd.f32 %v850_v2, %v2226_v33 }
 0x198   :  { %v1027_v42 = vpop.f32.mrf.mxu2  ;;  %v921_v37 = vpop.f32.mrf.mxu0 }
 0x199   :  { %v910_v8 = vadd.f32 %v909_v27, %v851_v36 }
 0x19a   :  { %v970_v34 = vpop.f32.mrf.mxu1 }
 0x19b   :  { %v969_v46 = vadd.f32 %v968_v16, %v910_v8 }
 0x19d   :  { %v1028_v47 = vadd.f32 %v1027_v42, %v969_v46 }
 0x19e   :  { %v852_v22 = vpop.f32.mrf.mxu3 }
 0x19f   :  { %1057 = vst.msk [vmem:[%s2447_s2 + $0x70] sm:$0xff] %vm1042_vm1, %v1028_v47  ;;  %v853_v43 = vadd.f32 %v852_v22, %v2248_v17 }
 0x1a0   :  { %v1029_v48 = vpop.f32.mrf.mxu2 }
 0x1a1   :  { %v912_v50 = vadd.f32 %v911_v40, %v853_v43 }
 0x1a2   :  { %v973_v54 = vpop.f32.mrf.mxu1 }
 0x1a3   :  { %v971_v51 = vadd.f32 %v970_v34, %v912_v50 }
 0x1a5   :  { %v1030_v33 = vadd.f32 %v1029_v48, %v971_v51 }
 0x1a6   :  { %v855_v10 = vpop.f32.mrf.mxu3 }
 0x1a7   :  { %1058 = vst.msk [vmem:[%s2447_s2 + $0x78] sm:$0xff] %vm1042_vm1, %v1030_v33  ;;  %v856_v56 = vadd.f32 %v855_v10, %v2259_v4 }
 0x1a8   :  { %v1032_v57 = vpop.f32.mrf.mxu2 }
 0x1a9   :  { %v915_v39 = vadd.f32 %v914_v52, %v856_v56 }
 0x1aa   :  { %v975_v17 = vpop.f32.mrf.mxu1 }
 0x1ab   :  { %v974_v62 = vadd.f32 %v973_v54, %v915_v39 }
 0x1ad   :  { %v1033_v58 = vadd.f32 %v1032_v57, %v974_v62 }
 0x1ae   :  { %v857_v18 = vpop.f32.mrf.mxu3 }
 0x1af   :  { %1059 = vst.msk [vmem:[%s2447_s2 + $0x80] sm:$0xff] %vm1042_vm1, %v1033_v58  ;;  %v858_v60 = vadd.f32 %v857_v18, %v2281_v30 }
 0x1b0   :  { %v1034_v15 = vpop.f32.mrf.mxu2 }
 0x1b1   :  { %v917_v61 = vadd.f32 %v916_v24, %v858_v60 }
 0x1b2   :  { %v978_v11 = vpop.f32.mrf.mxu1 }
 0x1b3   :  { %v976_v35 = vadd.f32 %v975_v17, %v917_v61 }
 0x1b5   :  { %v1035_v9 = vadd.f32 %v1034_v15, %v976_v35 }
 0x1b6   :  { %v860_v4 = vpop.f32.mrf.mxu3 }
 0x1b7   :  { %1060 = vst.msk [vmem:[%s2447_s2 + $0x88] sm:$0xff] %vm1042_vm1, %v1035_v9  ;;  %v861_v53 = vadd.f32 %v860_v4, %v2292_v45 }
 0x1b8   :  { %v1037_v0 = vpop.f32.mrf.mxu2 }
 0x1b9   :  { %v920_v41 = vadd.f32 %v919_v44, %v861_v53 }
 0x1ba   :  { %v980_v14 = vpop.f32.mrf.mxu1 }
 0x1bb   :  { %v979_v13 = vadd.f32 %v978_v11, %v920_v41 }
 0x1bd   :  { %v1038_v29 = vadd.f32 %v1037_v0, %v979_v13 }
 0x1be   :  { %v862_v49 = vpop.f32.mrf.mxu3 }
 0x1bf   :  { %1061 = vst.msk [vmem:[%s2447_s2 + $0x90] sm:$0xff] %vm1042_vm1, %v1038_v29  ;;  %v863_v30 = vadd.f32 %v862_v49, %v2312_v5 }
 0x1c0   :  { %v1039_v23 = vpop.f32.mrf.mxu2 }
 0x1c1   :  { %v922_v25 = vadd.f32 %v921_v37, %v863_v30 }
 0x1c3   :  { %v981_v20 = vadd.f32 %v980_v14, %v922_v25 }
 0x1c5   :  { %v1040_v19 = vadd.f32 %v1039_v23, %v981_v20 }
 0x1c7   :  { %1062 = vst.msk [vmem:[%s2447_s2 + $0x98] sm:$0xff] %vm1042_vm1, %v1040_v19 }

</bundles_post_ra>
